<compile_context>
chip_gen: v7x
topology: tpu7x:2x2x1
jax: 0.10.0
libtpu: 0.0.40
codegen_flags: <defaults>
</compile_context>

<pallas_src>
import functools

import jax
import jax.numpy as jnp
from jax.experimental import pallas as pl
from jax.experimental.pallas import tpu as pltpu


# ~2 MiB of x per grid step; double-buffered x + bits + out stays well under
# 48 MiB, which fits every generation (v7x has 64 MiB physical VMEM per TC).
_TARGET_TILE_BYTES = 2 << 20
_VMEM_LIMIT_BYTES = 48 * 1024 * 1024


def _pick_tile_rows(rows_total, cols, itemsize, target_bytes=_TARGET_TILE_BYTES):
    """Largest row-tile (multiple of 8) whose x-block is ~target_bytes."""
    rows = target_bytes // max(1, cols * itemsize)
    rows = (rows // 8) * 8
    rows = max(rows, 8)
    if rows >= rows_total:
        return rows_total          # full extent is always a legal block size
    return int(rows)


# ----------------------------------------------------------------------------
# Eval-mode kernel:  out = x * (mask * 1/(1-p))   (mask pre-scaled in wrapper)
# ----------------------------------------------------------------------------
def _mdropout_eval_kernel(mask_ref, x_ref, o_ref):
    # mask_ref: (1, D) f32, resident (same block every grid step), broadcast
    # over the batch tile.  Multiply promotes to f32, cast back at the store.
    o_ref[...] = (x_ref[...] * mask_ref[...]).astype(o_ref.dtype)


def mdropout_eval(x, mask, p, *, target_bytes=_TARGET_TILE_BYTES):
    """Eval-mode MDropout forward.  x: (B, D), mask: (D,) int (buffer)."""
    B, D = x.shape
    inv_keep = 1.0 / (1.0 - p)                       # matches torch (inf if p==1)
    mask_scaled = (mask.astype(jnp.float32) * inv_keep).reshape(1, D)

    tile_b = _pick_tile_rows(B, D, jnp.dtype(x.dtype).itemsize, target_bytes)
    grid = (pl.cdiv(B, tile_b),)
    return pl.pallas_call(
        _mdropout_eval_kernel,
        out_shape=jax.ShapeDtypeStruct((B, D), x.dtype),
        grid_spec=pltpu.PrefetchScalarGridSpec(
            num_scalar_prefetch=0,
            grid=grid,
            in_specs=[
                pl.BlockSpec((1, D), lambda i: (0, 0)),        # mask (resident)
                pl.BlockSpec((tile_b, D), lambda i: (i, 0)),   # x tile
            ],
            out_specs=pl.BlockSpec((tile_b, D), lambda i: (i, 0)),
        ),
        compiler_params=pltpu.CompilerParams(
            dimension_semantics=("parallel",),
            vmem_limit_bytes=_VMEM_LIMIT_BYTES),
    )(mask_scaled, x)


# ----------------------------------------------------------------------------
# Train-mode kernel:  out = where(bits >= p*2^32, x / (1-p), 0)
# ----------------------------------------------------------------------------
def _mdropout_train_kernel(x_ref, bits_ref, o_ref, *, threshold, scale):
    keep = bits_ref[...] >= jnp.uint32(threshold)
    o_ref[...] = jnp.where(keep, x_ref[...] * scale, 0.0).astype(o_ref.dtype)


def _dropout_2d(x2, bits2, threshold, scale, target_bytes):
    R, C = x2.shape
    tile_r = _pick_tile_rows(R, C, jnp.dtype(x2.dtype).itemsize, target_bytes)
    grid = (pl.cdiv(R, tile_r),)
    return pl.pallas_call(
        functools.partial(_mdropout_train_kernel,
                          threshold=threshold, scale=scale),
        out_shape=jax.ShapeDtypeStruct((R, C), x2.dtype),
        grid_spec=pltpu.PrefetchScalarGridSpec(
            num_scalar_prefetch=0,
            grid=grid,
            in_specs=[
                pl.BlockSpec((tile_r, C), lambda i: (i, 0)),   # x tile
                pl.BlockSpec((tile_r, C), lambda i: (i, 0)),   # random bits tile
            ],
            out_specs=pl.BlockSpec((tile_r, C), lambda i: (i, 0)),
        ),
        compiler_params=pltpu.CompilerParams(
            dimension_semantics=("parallel",),
            vmem_limit_bytes=_VMEM_LIMIT_BYTES),
    )(x2, bits2)


def mdropout_train(x, p, key, *, target_bytes=_TARGET_TILE_BYTES):
    """Train-mode MDropout forward (dropout, keep prob 1-p).  x: (B, D)."""
    if p <= 0.0:
        return x
    if p >= 1.0:
        return jnp.zeros_like(x)     # torch dropout(p=1) zeroes everything
    B, D = x.shape
    bits = jax.random.bits(key, (B, D), dtype=jnp.uint32)   # glue, not hot path
    threshold = min(int(round(p * (1 << 32))), (1 << 32) - 1)
    scale = 1.0 / (1.0 - p)

    # Lane-dense layout: if D is not a multiple of 128 but the flat size is,
    # present a (N/128, 128) slab so stores are full-lane vst, not vst.msk.
    if D % 128 != 0 and (B * D) % 128 == 0:
        R, C = (B * D) // 128, 128
        out = _dropout_2d(x.reshape(R, C), bits.reshape(R, C),
                          threshold, scale, target_bytes)
        return out.reshape(B, D)
    return _dropout_2d(x, bits, threshold, scale, target_bytes)


# ----------------------------------------------------------------------------
# Demo / self-check
# ----------------------------------------------------------------------------
if __name__ == "__main__":
    key = jax.random.PRNGKey(0)
    B, D = 8, 128          # batch, feature dim (`dim` of the MDropout module)
    p = 0.25

    kx, kmask, kdrop = jax.random.split(key, 3)
    x = jax.random.normal(kx, (B, D), dtype=jnp.float32)

    # Module __init__ registers mask = ones(dim); .sample() draws
    # Bernoulli(1-p).  Test both a sampled mask and the default all-ones mask.
    mask = jax.random.bernoulli(kmask, 1.0 - p, (D,)).astype(jnp.int32)

    # ---- eval path (self.training == False) ----
    out_eval = jax.block_until_ready(mdropout_eval(x, mask, p))
    ref_eval = x * mask.astype(jnp.float32).reshape(1, -1) * (1.0 / (1.0 - p))
    assert out_eval.shape == x.shape and out_eval.dtype == x.dtype
    assert jnp.allclose(out_eval, ref_eval, rtol=1e-6, atol=1e-6)

    ones_mask = jnp.ones((D,), dtype=jnp.int32)
    out_ones = jax.block_until_ready(mdropout_eval(x, ones_mask, p))
    assert jnp.allclose(out_ones, x * (1.0 / (1.0 - p)), rtol=1e-6, atol=1e-6)

    # ---- train path (self.training == True): dropout with random keep mask ----
    out_train = jax.block_until_ready(mdropout_train(x, p, kdrop))
    assert out_train.shape == x.shape and out_train.dtype == x.dtype
    # Exact reference using the same bits / same integer threshold.
    bits_ref = jax.random.bits(kdrop, (B, D), dtype=jnp.uint32)
    thr = min(int(round(p * (1 << 32))), (1 << 32) - 1)
    ref_train = jnp.where(bits_ref >= jnp.uint32(thr), x * (1.0 / (1.0 - p)), 0.0)
    assert jnp.allclose(out_train, ref_train, rtol=1e-6, atol=1e-6)
    # Sanity: every element is either exactly 0 or x/(1-p).
    scaled = x * (1.0 / (1.0 - p))
    ok_elem = jnp.logical_or(jnp.isclose(out_train, 0.0),
                             jnp.isclose(out_train, scaled, rtol=1e-6, atol=1e-6))
    assert bool(jnp.all(ok_elem))

    print("KERNEL_OK")
</pallas_src>

<mosaic_0001>
module attributes {stable_mosaic.version = 11 : i64} {
  func.func @_mdropout_eval_kernel(%arg0: i32, %arg1: memref<1x128xf32, #tpu.memory_space<vmem>>, %arg2: memref<8x128xf32, #tpu.memory_space<vmem>>, %arg3: memref<8x128xf32, #tpu.memory_space<vmem>>) attributes {dimension_semantics = [#tpu.dimension_semantics<parallel>], iteration_bounds = array<i64: 1>, scalar_prefetch = 0 : i64, scratch_operands = 0 : i64, tpu.core_type = #tpu.core_type<tc>, window_params = [{pipeline_mode = #tpu.pipeline_mode<synchronous>, transform_indices = @transform_0, window_bounds = array<i64: 1, 128>}, {transform_indices = @transform_1, window_bounds = array<i64: 8, 128>}, {transform_indices = @transform_2, window_bounds = array<i64: 8, 128>}]} {
    %c0 = arith.constant 0 : index
    %c0_0 = arith.constant 0 : index
    %0 = vector.load %arg2[%c0, %c0_0] : memref<8x128xf32, #tpu.memory_space<vmem>>, vector<8x128xf32>
    %c0_1 = arith.constant 0 : index
    %c0_2 = arith.constant 0 : index
    %1 = vector.load %arg1[%c0_1, %c0_2] : memref<1x128xf32, #tpu.memory_space<vmem>>, vector<1x128xf32>
    %2 = vector.broadcast %1 : vector<1x128xf32> to vector<8x128xf32>
    %3 = arith.mulf %0, %2 : vector<8x128xf32>
    %c0_3 = arith.constant 0 : index
    %c0_4 = arith.constant 0 : index
    %4 = vector.load %arg3[%c0_3, %c0_4] : memref<8x128xf32, #tpu.memory_space<vmem>>, vector<8x128xf32>
    tpu.vector_store %arg3[%c0_3, %c0_4], %3 {strides = array<i32>} : memref<8x128xf32, #tpu.memory_space<vmem>>, vector<8x128xf32>,
    return
  }
  func.func @transform_0(%arg0: i32) -> (i32, i32) {
    %c0_i32 = arith.constant 0 : i32
    %c0_i32_0 = arith.constant 0 : i32
    %c0_i32_1 = arith.constant 0 : i32
    return %c0_i32, %c0_i32_0 : i32, i32
  }
  func.func @transform_1(%arg0: i32) -> (i32, i32) {
    %c0_i32 = arith.constant 0 : i32
    %c0_i32_0 = arith.constant 0 : i32
    return %arg0, %c0_i32 : i32, i32
  }
  func.func @transform_2(%arg0: i32) -> (i32, i32) {
    %c0_i32 = arith.constant 0 : i32
    %c0_i32_0 = arith.constant 0 : i32
    return %arg0, %c0_i32 : i32, i32
  }
}

</mosaic_0001>

<bundles_post_ra>
// kernel: tpu_custom_call.1
= control target key start
LH: loop header
LB: loop body
LE: loop exit
PB: predicated region body
PF: predicated region fallthrough
CT: control target
= control target key end

     0   :  { %7 = vsyncpa [#allocation3], 0  ;;  %s192_s0 = inlined_call_operand.hbm [shape: f32[1,128], index: 0, kind: input, shape index: {}]   ;;  %s193_s1 = inlined_call_operand.hbm [shape: f32[8,128], index: 1, kind: input, shape index: {}]   ;;  %s194_s2 = inlined_call_operand.hbm [shape: f32[8,128], index: 2, kind: output, shape index: {}]  }
   0x1   :  { %8 = vsyncpa [#allocation6], 0 }
   0x2   :  { %9 = vsyncpa [#allocation4], 0  ;;  %s138_s9 = smov [#allocation2]   ;;  %s139_s11 = smov [#allocation5]  }
   0x3   :  { %s16_s10 = sshll.u32 %s138_s9, 4  ;;  %s26_s12 = sshll.u32 %s139_s11, 4  ;;  %s17_s10 = int_to_ptr.vmem [resolvable:$true] %s16_s10  ;;  %s27_s12 = int_to_ptr.vmem [resolvable:$true] %s26_s12 }
   0x4   :  { %s66_s15 = scalar_lea.hbm %s192_s0, 16 }
   0x5   :  { %p67_p0 = scmp.ne.s32.totalorder %s192_s0, %s66_s15  ;;  %p70_p1 = scmp.lt.u32.totalorder %s66_s15, %s192_s0 }
   0x7   :  { %p72_p2 = pnand %p70_p1, %p67_p0 }
   0x9   :  { %75 = shalt.err (!%p72_p2)
}
   0xa   :  { %s76_s20 = scalar_lea.vmem %s17_s10, 16  ;;  %s80_s21 = scalar_lea.vmem %s17_s10, 32 }
   0xb   :  { %p77_p3 = scmp.ne.s32.totalorder %s17_s10, %s76_s20  ;;  %p81_p4 = scmp.lt.s32.totalorder %s17_s10, %s17_s10 }
   0xc   :  { %p82_p5 = scmp.lt.s32.totalorder %s80_s21, %s76_s20 }
   0xe   :  { %p83_p6 = por %p82_p5, %p81_p4 }
  0x10   :  { %p84_p7 = pnand %p83_p6, %p77_p3 }
  0x12   :  { %87 = shalt.err (!%p84_p7)
}
  0x13   :  { %19 = dma.hbm_to_vmem [thread:$0]  %s192_s0, 16, %s17_s10, [#allocation3]  }
  0x14   :  { %s88_s26 = scalar_lea.hbm %s193_s1, 128 }
  0x15   :  { %p89_p8 = scmp.ne.s32.totalorder %s193_s1, %s88_s26  ;;  %p92_p9 = scmp.lt.u32.totalorder %s88_s26, %s193_s1 }
  0x17   :  { %p94_p10 = pnand %p92_p9, %p89_p8 }
  0x19   :  { %97 = shalt.err (!%p94_p10)
}
  0x1a   :  { %s98_s3 = scalar_lea.vmem %s27_s12, 128  ;;  %p103_p12 = scmp.lt.s32.totalorder %s27_s12, %s27_s12 }
  0x1b   :  { %p99_p11 = scmp.ne.s32.totalorder %s27_s12, %s98_s3  ;;  %p104_p13 = scmp.lt.s32.totalorder %s98_s3, %s98_s3 }
  0x1d   :  { %p105_p0 = por %p104_p13, %p103_p12 }
  0x1f   :  { %p106_p1 = pnand %p105_p0, %p99_p11 }
  0x21   :  { %109 = shalt.err (!%p106_p1)
}
  0x22   :  { %29 = dma.hbm_to_vmem [thread:$0]  %s193_s1, 128, %s27_s12, [#allocation6]  }
  0x23   :  { %132 = dma.done.wait [#allocation3], 16  }
  0x24   :  { %133 = vsyncadd [#allocation3], 4294967280 }
  0x25   :  { %134 = dma.done.wait [#allocation6], 128  }
  0x26   :  { %135 = vsyncadd [#allocation6], 4294967168  ;;  %s140_s5 = smov [#allocation7]   ;;  %v36_v0 = vld [vmem:[#allocation5] sm:$0xff]  ;;  %v62_v1 = vld [vmem:[#allocation2] ss:$0 sm:$0xff] }
  0x27   :  { %s52_s6 = sshll.u32 %s140_s5, 4  ;;  %v44_v2 = vmul.f32 %v62_v1, %v36_v0  ;;  %s53_s6 = int_to_ptr.vmem [resolvable:$true] %s52_s6 }
  0x28   :  { %s110_s7 = scalar_lea.vmem %s53_s6, 128  ;;  %p115_p3 = scmp.lt.s32.totalorder %s53_s6, %s53_s6 }
  0x29   :  { %45 = vst [vmem:[#allocation7] sm:$0xff] %v44_v2  ;;  %p111_p2 = scmp.ne.s32.totalorder %s53_s6, %s110_s7  ;;  %p116_p4 = scmp.lt.s32.totalorder %s110_s7, %s110_s7 }
  0x2b   :  { %p117_p5 = por %p116_p4, %p115_p3 }
  0x2d   :  { %p118_p6 = pnand %p117_p5, %p111_p2 }
  0x2f   :  { %121 = shalt.err (!%p118_p6)
}
  0x30   :  { %s122_s9 = scalar_lea.hbm %s194_s2, 128 }
  0x31   :  { %p123_p7 = scmp.ne.s32.totalorder %s194_s2, %s122_s9  ;;  %p126_p8 = scmp.lt.u32.totalorder %s122_s9, %s194_s2 }
  0x33   :  { %p128_p9 = pnand %p126_p8, %p123_p7 }
  0x35   :  { %131 = shalt.err (!%p128_p9)
}
  0x36   :  { %55 = dma.vmem_to_hbm [thread:$0]  %s53_s6, 128, %s194_s2, [#allocation4]  }
  0x37   :  { %136 = dma.done.wait [#allocation4], 128  }
  0x38   :  { %137 = vsyncadd [#allocation4], 4294967168 }
  0x39   :  { %59 = vsyncpa [#allocation3], 1 }
  0x3a   :  { %60 = vsyncpa [#allocation6], 1 }
  0x3b   :  { %61 = vsyncpa [#allocation4], 1 }

</bundles_post_ra>
